<compile_context>
chip_gen: v7x
topology: tpu7x:2x2x1
jax: 0.10.0
libtpu: 0.0.40
codegen_flags: <defaults>
</compile_context>

<pallas_src>
import math

import jax
import jax.numpy as jnp
from jax import lax
from jax.experimental import pallas as pl
from jax.experimental.pallas import tpu as pltpu


def seq_attn_kernel(x_ref, y_ref, mask_ref, w_ref, b_ref, o_ref):
    # x_ref: (Bt, L1p, Hp) bf16   y_ref: (Bt, L2p, Hp) bf16
    # mask_ref: (Bt, L2p) f32 (1.0 == padding)
    # w_ref: (Hp, Hp) bf16, PyTorch Linear layout (out = in @ W.T + b)
    # b_ref: (1, Hp) f32
    bt, l1, h = x_ref.shape
    _, l2, _ = y_ref.shape

    x = x_ref[...]
    y = y_ref[...]
    w = w_ref[...]
    b = b_ref[...]
    mask = mask_ref[...]

    # ---- fused shared Linear + ReLU: ONE MXU call on the concatenated slab.
    # L1p/L2p are sublane multiples, so these merges/splits are layout-free.
    xy = jnp.concatenate([x.reshape(bt * l1, h), y.reshape(bt * l2, h)], axis=0)
    dn_proj = (((1,), (1,)), ((), ()))              # contract last dims == xy @ W.T
    proj = lax.dot_general(xy, w, dn_proj, preferred_element_type=jnp.float32)
    proj = jnp.maximum(proj + b, 0.0).astype(jnp.bfloat16)   # bias + ReLU in f32
    x_proj = proj[: bt * l1, :].reshape(bt, l1, h)
    y_proj = proj[bt * l1:, :].reshape(bt, l2, h)

    # ---- attention scores (Bt, L1, L2): bf16 inputs, f32 accumulation, no .T.
    dn_scores = (((2,), (2,)), ((0,), (0,)))        # batch Bt, contract H
    scores = lax.dot_general(x_proj, y_proj, dn_scores,
                             preferred_element_type=jnp.float32)

    # mask: 1.0 == padding -> -inf (same NaN semantics as the reference when a
    # whole row of y_mask is 1).
    scores = jnp.where(mask[:, None, :] > 0.0, -jnp.inf, scores)

    # ---- softmax over L2 (f32 math).
    m = jnp.max(scores, axis=-1, keepdims=True)
    e = jnp.exp(scores - m)
    denom = jnp.sum(e, axis=-1, keepdims=True)
    alpha = e * pl.reciprocal(denom, approx=True)   # EUP vrcp slot

    # ---- weighted sum of the ORIGINAL y values: (Bt,L1,L2) @ (Bt,L2,Hp).
    dn_out = (((2,), (1,)), ((0,), (0,)))
    out = lax.dot_general(alpha.astype(jnp.bfloat16), y, dn_out,
                          preferred_element_type=jnp.float32)
    o_ref[...] = out.astype(o_ref.dtype)


def _round_up(v, m):
    return ((v + m - 1) // m) * m


def _vmem_limit_bytes():
    """Generation-aware scoped VMEM limit: ~3/4 of capacity, capped at 96 MiB.
    v7x (64 MiB) -> 48 MiB; v6e/v5e (128 MiB) -> 96 MiB; unknown -> 48 MiB."""
    cap = None
    try:
        info = pltpu.get_tpu_info()
        cap = getattr(info, "vmem_capacity_bytes", None)
    except Exception:
        cap = None
    if not cap:
        cap = 64 * 1024 * 1024          # conservative fallback (v7x per-TC VMEM)
    return min(int(cap) * 3 // 4, 96 * 1024 * 1024)


def _estimate_vmem_bytes(bt, l1p, l2p, hp, out_bytes):
    """Rough per-step VMEM footprint: double-buffered pipeline blocks plus the
    in-kernel intermediates the compiler has to hold."""
    bf16, f32 = 2, 4
    blocks = 2 * (bt * l1p * hp * bf16          # x block
                  + bt * l2p * hp * bf16        # y block
                  + bt * l2p * f32              # mask block
                  + bt * l1p * hp * out_bytes   # out block
                  + hp * hp * bf16              # W (constant, still 2x buffered)
                  + hp * f32)                   # bias
    rows = bt * (l1p + l2p)
    inter = (rows * hp * bf16                   # concatenated bf16 slab
             + rows * hp * f32                  # f32 projection accumulator
             + rows * hp * bf16                 # bf16-cast projections
             + 3 * bt * l1p * l2p * f32         # scores + exp + alpha
             + bt * l1p * hp * f32)             # f32 output accumulator
    return blocks + inter


def _pick_batch_tile(B, l1p, l2p, hp, out_bytes, budget):
    """Largest divisor Bt of B whose estimated VMEM footprint fits the budget."""
    best = 1
    for bt in range(1, B + 1):
        if B % bt != 0:
            continue
        if _estimate_vmem_bytes(bt, l1p, l2p, hp, out_bytes) <= budget:
            best = bt
    return best


def seq_attn_match(x, y, y_mask, W, b):
    """x:(B,L1,H) y:(B,L2,H) y_mask:(B,L2) W:(H,H) b:(H,) -> (B,L1,H)"""
    B, L1, H = x.shape
    _, L2, _ = y.shape
    out_dtype = x.dtype

    LANE, SUB = 128, 16                  # lane width; bf16 sublane pack
    Hp = _round_up(H, LANE)
    L1p = _round_up(L1, SUB)
    L2p = _round_up(L2, SUB)

    # Cast to bf16 and zero-pad in one shot (XLA fuses the pad with the cast,
    # so padding does not add an extra HBM round trip on top of the cast).
    # Zero padding is exact: padded features project to relu(0)=0 and thus
    # contribute 0 to scores; padded L2 positions are masked with 1.0 below;
    # padded L1 rows / H columns are sliced off the output.
    x_b = jnp.pad(x.astype(jnp.bfloat16), ((0, 0), (0, L1p - L1), (0, Hp - H)))
    y_b = jnp.pad(y.astype(jnp.bfloat16), ((0, 0), (0, L2p - L2), (0, Hp - H)))
    W_b = jnp.pad(W.astype(jnp.bfloat16), ((0, Hp - H), (0, Hp - H)))
    b2 = jnp.pad(b.astype(jnp.float32), ((0, Hp - H),)).reshape(1, Hp)
    mask_f = jnp.pad(y_mask.astype(jnp.float32), ((0, 0), (0, L2p - L2)),
                     constant_values=1.0)

    vmem_limit = _vmem_limit_bytes()
    budget = vmem_limit - 8 * 1024 * 1024      # headroom for compiler scratch
    out_bytes = jnp.dtype(out_dtype).itemsize
    Bt = _pick_batch_tile(B, L1p, L2p, Hp, out_bytes, budget)
    # TODO(synk): on v7x additionally prefer an even grid length so the
    # "parallel" batch axis splits evenly across the 2 TensorCores.
    grid = (B // Bt,)

    out = pl.pallas_call(
        seq_attn_kernel,
        out_shape=jax.ShapeDtypeStruct((B, L1p, Hp), out_dtype),
        grid_spec=pltpu.PrefetchScalarGridSpec(
            num_scalar_prefetch=0,
            grid=grid,
            in_specs=[
                pl.BlockSpec((Bt, L1p, Hp), lambda bi: (bi, 0, 0)),
                pl.BlockSpec((Bt, L2p, Hp), lambda bi: (bi, 0, 0)),
                pl.BlockSpec((Bt, L2p), lambda bi: (bi, 0)),
                # Constant block index -> fetched once, never re-DMAed.
                pl.BlockSpec((Hp, Hp), lambda bi: (0, 0)),
                pl.BlockSpec((1, Hp), lambda bi: (0, 0)),
            ],
            out_specs=pl.BlockSpec((Bt, L1p, Hp), lambda bi: (bi, 0, 0)),
        ),
        compiler_params=pltpu.CompilerParams(
            dimension_semantics=("parallel",),
            vmem_limit_bytes=vmem_limit,
        ),
    )(x_b, y_b, mask_f, W_b, b2)

    if L1p != L1 or Hp != H:
        out = out[:, :L1, :H]
    return out


def seq_attn_match_ref(x, y, y_mask, W, b):
    """Pure-JAX (f32) reference for verification."""
    x_proj = jax.nn.relu(jnp.einsum("bld,hd->blh", x, W) + b)
    y_proj = jax.nn.relu(jnp.einsum("bld,hd->blh", y, W) + b)
    scores = jnp.einsum("bqh,bkh->bqk", x_proj, y_proj)
    scores = jnp.where(y_mask[:, None, :] > 0, -jnp.inf, scores)
    alpha = jax.nn.softmax(scores, axis=-1)
    return jnp.einsum("bqk,bkh->bqh", alpha, y)


if __name__ == "__main__":
    key = jax.random.PRNGKey(0)
    B, L1, L2, H = 2, 8, 8, 32

    k1, k2, k3, k4 = jax.random.split(key, 4)
    x = jax.random.normal(k1, (B, L1, H), dtype=jnp.float32)
    y = jax.random.normal(k2, (B, L2, H), dtype=jnp.float32)

    # Deterministic mask: last 2 positions of y are padding (1), rest valid (0).
    y_mask = jnp.zeros((B, L2), dtype=jnp.float32).at[:, L2 - 2:].set(1.0)

    # Deterministic Linear(H, H) parameters (PyTorch-style uniform init bound).
    bound = 1.0 / math.sqrt(H)
    W = jax.random.uniform(k3, (H, H), jnp.float32, -bound, bound)
    b = jax.random.uniform(k4, (H,), jnp.float32, -bound, bound)

    out = seq_attn_match(x, y, y_mask, W, b)
    out = jax.block_until_ready(out)

    ref = seq_attn_match_ref(x, y, y_mask, W, b)
    assert out.shape == (B, L1, H)
    # bf16 matmul inputs (projection / scores / output, f32 accumulation) ->
    # tolerance loosened vs. the pure-f32 reference.
    assert jnp.allclose(out, ref, atol=5e-2, rtol=5e-2), "mismatch vs reference"

    print("KERNEL_OK")
</pallas_src>

<mosaic_0001>
module attributes {stable_mosaic.version = 11 : i64} {
  func.func @seq_attn_kernel(%arg0: i32, %arg1: memref<2x16x128xbf16, #tpu.memory_space<vmem>>, %arg2: memref<2x16x128xbf16, #tpu.memory_space<vmem>>, %arg3: memref<2x16xf32, #tpu.memory_space<vmem>>, %arg4: memref<128x128xbf16, #tpu.memory_space<vmem>>, %arg5: memref<1x128xf32, #tpu.memory_space<vmem>>, %arg6: memref<2x16x128xf32, #tpu.memory_space<vmem>>) attributes {dimension_semantics = [#tpu.dimension_semantics<parallel>], iteration_bounds = array<i64: 1>, scalar_prefetch = 0 : i64, scratch_operands = 0 : i64, tpu.core_type = #tpu.core_type<tc>, window_params = [{transform_indices = @transform_0, window_bounds = array<i64: 2, 16, 128>}, {transform_indices = @transform_1, window_bounds = array<i64: 2, 16, 128>}, {transform_indices = @transform_2, window_bounds = array<i64: 2, 16>}, {pipeline_mode = #tpu.pipeline_mode<synchronous>, transform_indices = @transform_3, window_bounds = array<i64: 128, 128>}, {pipeline_mode = #tpu.pipeline_mode<synchronous>, transform_indices = @transform_4, window_bounds = array<i64: 1, 128>}, {transform_indices = @transform_5, window_bounds = array<i64: 2, 16, 128>}]} {
    %c0 = arith.constant 0 : index
    %c0_0 = arith.constant 0 : index
    %c0_1 = arith.constant 0 : index
    %0 = vector.load %arg1[%c0, %c0_0, %c0_1] : memref<2x16x128xbf16, #tpu.memory_space<vmem>>, vector<2x16x128xbf16>
    %c0_2 = arith.constant 0 : index
    %c0_3 = arith.constant 0 : index
    %c0_4 = arith.constant 0 : index
    %1 = vector.load %arg2[%c0_2, %c0_3, %c0_4] : memref<2x16x128xbf16, #tpu.memory_space<vmem>>, vector<2x16x128xbf16>
    %c0_5 = arith.constant 0 : index
    %c0_6 = arith.constant 0 : index
    %2 = vector.load %arg4[%c0_5, %c0_6] : memref<128x128xbf16, #tpu.memory_space<vmem>>, vector<128x128xbf16>
    %c0_7 = arith.constant 0 : index
    %c0_8 = arith.constant 0 : index
    %3 = vector.load %arg5[%c0_7, %c0_8] : memref<1x128xf32, #tpu.memory_space<vmem>>, vector<1x128xf32>
    %c0_9 = arith.constant 0 : index
    %c0_10 = arith.constant 0 : index
    %4 = vector.load %arg3[%c0_9, %c0_10] : memref<2x16xf32, #tpu.memory_space<vmem>>, vector<2x16xf32>
    %5 = vector.shape_cast %0 : vector<2x16x128xbf16> to vector<32x128xbf16>
    %6 = vector.shape_cast %1 : vector<2x16x128xbf16> to vector<32x128xbf16>
    %7 = tpu.concatenate %5, %6 in 0 : vector<32x128xbf16>, vector<32x128xbf16> -> vector<64x128xbf16>
    %cst = arith.constant dense<0.000000e+00> : vector<64x128xf32>
    %8 = tpu.matmul %7, %2, %cst {dimension_numbers = #tpu.dot_dimension_numbers<[1], [1], [0], [0], [0, 0, 1, 0], [], []>} : vector<64x128xbf16>, vector<128x128xbf16>, vector<64x128xf32> -> vector<64x128xf32>
    %9 = vector.broadcast %3 : vector<1x128xf32> to vector<64x128xf32>
    %10 = arith.addf %8, %9 : vector<64x128xf32>
    %cst_11 = arith.constant 0.000000e+00 : f32
    %11 = vector.broadcast %cst_11 : f32 to vector<64x128xf32>
    %12 = arith.maximumf %10, %11 : vector<64x128xf32>
    %13 = arith.truncf %12 : vector<64x128xf32> to vector<64x128xbf16>
    %14 = vector.extract_strided_slice %13 {offsets = [0, 0], sizes = [32, 128], strides = [1, 1]} : vector<64x128xbf16> to vector<32x128xbf16>
    %15 = vector.shape_cast %14 : vector<32x128xbf16> to vector<2x16x128xbf16>
    %16 = vector.extract_strided_slice %13 {offsets = [32, 0], sizes = [32, 128], strides = [1, 1]} : vector<64x128xbf16> to vector<32x128xbf16>
    %17 = vector.shape_cast %16 : vector<32x128xbf16> to vector<2x16x128xbf16>
    %cst_12 = arith.constant dense<0.000000e+00> : vector<2x16x16xf32>
    %18 = tpu.matmul %15, %17, %cst_12 {dimension_numbers = #tpu.dot_dimension_numbers<[2], [2], [1], [1], [0, 0, 0, 1, 1, 1], [0], [0]>} : vector<2x16x128xbf16>, vector<2x16x128xbf16>, vector<2x16x16xf32> -> vector<2x16x16xf32>
    %19 = vector.shape_cast %4 : vector<2x16xf32> to vector<2x1x16xf32>
    %cst_13 = arith.constant 0.000000e+00 : f32
    %20 = vector.broadcast %cst_13 : f32 to vector<2x1x16xf32>
    %21 = arith.cmpf ogt, %19, %20 : vector<2x1x16xf32>
    %cst_14 = arith.constant 0xFF800000 : f32
    %22 = vector.shape_cast %21 : vector<2x1x16xi1> to vector<2x1x16xi1>
    %23 = vector.broadcast %22 : vector<2x1x16xi1> to vector<2x16x16xi1>
    %24 = vector.broadcast %cst_14 : f32 to vector<2x16x16xf32>
    %25 = arith.select %23, %24, %18 : vector<2x16x16xi1>, vector<2x16x16xf32>
    %cst_15 = arith.constant dense<0xFF800000> : vector<2x16xf32>
    %26 = vector.multi_reduction <maximumf>, %25, %cst_15 [2] : vector<2x16x16xf32> to vector<2x16xf32>
    %27 = vector.shape_cast %26 : vector<2x16xf32> to vector<2x16x1xf32>
    %28 = vector.broadcast %27 : vector<2x16x1xf32> to vector<2x16x16xf32>
    %29 = arith.subf %25, %28 : vector<2x16x16xf32>
    %30 = math.exp %29 : vector<2x16x16xf32>
    %cst_16 = arith.constant dense<0.000000e+00> : vector<2x16xf32>
    %31 = vector.multi_reduction <add>, %30, %cst_16 [2] : vector<2x16x16xf32> to vector<2x16xf32>
    %32 = vector.shape_cast %31 : vector<2x16xf32> to vector<2x16x1xf32>
    %33 = tpu.reciprocal %32 {approx = true} : vector<2x16x1xf32> -> vector<2x16x1xf32>
    %34 = vector.broadcast %33 : vector<2x16x1xf32> to vector<2x16x16xf32>
    %35 = arith.mulf %30, %34 : vector<2x16x16xf32>
    %36 = arith.truncf %35 : vector<2x16x16xf32> to vector<2x16x16xbf16>
    %cst_17 = arith.constant dense<0.000000e+00> : vector<2x16x128xf32>
    %37 = tpu.matmul %36, %1, %cst_17 {dimension_numbers = #tpu.dot_dimension_numbers<[2], [1], [1], [2], [0, 0, 0, 1, 1, 2], [0], [0]>} : vector<2x16x16xbf16>, vector<2x16x128xbf16>, vector<2x16x128xf32> -> vector<2x16x128xf32>
    %c0_18 = arith.constant 0 : index
    %c0_19 = arith.constant 0 : index
    %c0_20 = arith.constant 0 : index
    %38 = vector.load %arg6[%c0_18, %c0_19, %c0_20] : memref<2x16x128xf32, #tpu.memory_space<vmem>>, vector<2x16x128xf32>
    tpu.vector_store %arg6[%c0_18, %c0_19, %c0_20], %37 {strides = array<i32>} : memref<2x16x128xf32, #tpu.memory_space<vmem>>, vector<2x16x128xf32>,
    return
  }
  func.func @transform_0(%arg0: i32) -> (i32, i32, i32) {
    %c0_i32 = arith.constant 0 : i32
    %c0_i32_0 = arith.constant 0 : i32
    %c0_i32_1 = arith.constant 0 : i32
    return %arg0, %c0_i32, %c0_i32_0 : i32, i32, i32
  }
  func.func @transform_1(%arg0: i32) -> (i32, i32, i32) {
    %c0_i32 = arith.constant 0 : i32
    %c0_i32_0 = arith.constant 0 : i32
    %c0_i32_1 = arith.constant 0 : i32
    return %arg0, %c0_i32, %c0_i32_0 : i32, i32, i32
  }
  func.func @transform_2(%arg0: i32) -> (i32, i32) {
    %c0_i32 = arith.constant 0 : i32
    %c0_i32_0 = arith.constant 0 : i32
    return %arg0, %c0_i32 : i32, i32
  }
  func.func @transform_3(%arg0: i32) -> (i32, i32) {
    %c0_i32 = arith.constant 0 : i32
    %c0_i32_0 = arith.constant 0 : i32
    %c0_i32_1 = arith.constant 0 : i32
    return %c0_i32, %c0_i32_0 : i32, i32
  }
  func.func @transform_4(%arg0: i32) -> (i32, i32) {
    %c0_i32 = arith.constant 0 : i32
    %c0_i32_0 = arith.constant 0 : i32
    %c0_i32_1 = arith.constant 0 : i32
    return %c0_i32, %c0_i32_0 : i32, i32
  }
  func.func @transform_5(%arg0: i32) -> (i32, i32, i32) {
    %c0_i32 = arith.constant 0 : i32
    %c0_i32_0 = arith.constant 0 : i32
    %c0_i32_1 = arith.constant 0 : i32
    return %arg0, %c0_i32, %c0_i32_0 : i32, i32, i32
  }
}

</mosaic_0001>

<bundles_post_ra>
// kernel: tpu_custom_call.1
= control target key start
LH: loop header
LB: loop body
LE: loop exit
PB: predicated region body
PF: predicated region fallthrough
CT: control target
= control target key end

     0   :  { %10 = vsyncpa [#allocation3], 0  ;;  %s882_s0 = inlined_call_operand.hbm [shape: bf16[2,16,128], index: 0, kind: input, shape index: {}]   ;;  %s883_s1 = inlined_call_operand.hbm [shape: bf16[2,16,128], index: 1, kind: input, shape index: {}]   ;;  %s884_s2 = inlined_call_operand.vmem [shape: f32[2,16], index: 2, kind: input, shape index: {}]   ;;  %s885_s3 = inlined_call_operand.hbm [shape: bf16[128,128], index: 3, kind: input, shape index: {}]   ;;  %s886_s4 = inlined_call_operand.vmem [shape: f32[1,128], index: 4, kind: input, shape index: {}]   ;;  %s887_s5 = inlined_call_operand.hbm [shape: f32[2,16,128], index: 5, kind: output, shape index: {}]  }
   0x1   :  { %11 = vsyncpa [#allocation6], 0 }
   0x2   :  { %12 = vsyncpa [#allocation4], 0  ;;  %s744_s18 = smov [#allocation5]   ;;  %s745_s20 = smov [#allocation2]  }
   0x3   :  { %s30_s19 = sshll.u32 %s744_s18, 4  ;;  %s18_s21 = sshll.u32 %s745_s20, 4  ;;  %s31_s19 = int_to_ptr.vmem [resolvable:$true] %s30_s19  ;;  %s786_s21 = int_to_ptr.vmem [resolvable:$true] %s18_s21 }
   0x4   :  { %s650_s24 = scalar_lea.hbm %s883_s1, 256 }
   0x5   :  { %p651_p0 = scmp.ne.s32.totalorder %s883_s1, %s650_s24  ;;  %p654_p1 = scmp.lt.u32.totalorder %s650_s24, %s883_s1 }
   0x7   :  { %p656_p2 = pnand %p654_p1, %p651_p0 }
   0x9   :  { %659 = shalt.err (!%p656_p2)
}
   0xa   :  { %s660_s29 = scalar_lea.vmem %s31_s19, 256  ;;  %p665_p4 = scmp.lt.s32.totalorder %s31_s19, %s31_s19 }
   0xb   :  { %p661_p3 = scmp.ne.s32.totalorder %s31_s19, %s660_s29  ;;  %p666_p5 = scmp.lt.s32.totalorder %s660_s29, %s660_s29 }
   0xd   :  { %p667_p6 = por %p666_p5, %p665_p4 }
   0xf   :  { %p668_p7 = pnand %p667_p6, %p661_p3 }
  0x11   :  { %671 = shalt.err (!%p668_p7)
}
  0x12   :  { %s746_s30 = smov 64   ;;  %s747_s6 = smov 4  }
  0x13   :  { %36 = dma.hbm_to_vmem [thread:$0]  %s883_s1, 256, %s31_s19, [#allocation6], %s746_s30, %s746_s30, %s747_s6  }
  0x14   :  { %s672_s11 = scalar_lea.hbm %s882_s0, 256 }
  0x15   :  { %p673_p8 = scmp.ne.s32.totalorder %s882_s0, %s672_s11  ;;  %p676_p9 = scmp.lt.u32.totalorder %s672_s11, %s882_s0 }
  0x17   :  { %p678_p10 = pnand %p676_p9, %p673_p8 }
  0x19   :  { %681 = shalt.err (!%p678_p10)
}
  0x1a   :  { %s682_s16 = scalar_lea.vmem %s786_s21, 256  ;;  %p687_p12 = scmp.lt.s32.totalorder %s786_s21, %s786_s21 }
  0x1b   :  { %p683_p11 = scmp.ne.s32.totalorder %s786_s21, %s682_s16  ;;  %p688_p13 = scmp.lt.s32.totalorder %s682_s16, %s682_s16 }
  0x1d   :  { %p689_p0 = por %p688_p13, %p687_p12 }
  0x1f   :  { %p690_p1 = pnand %p689_p0, %p683_p11 }
  0x21   :  { %693 = shalt.err (!%p690_p1)
}
  0x22   :  { %24 = dma.hbm_to_vmem [thread:$0]  %s882_s0, 256, %s786_s21, [#allocation3], %s746_s30, %s746_s30, %s747_s6  }
  0x23   :  { %s748_s18 = smov [#allocation7]   ;;  %s694_s23 = scalar_lea.hbm %s885_s3, 1024 }
  0x24   :  { %s44_s19 = sshll.u32 %s748_s18, 4  ;;  %p695_p2 = scmp.ne.s32.totalorder %s885_s3, %s694_s23  ;;  %s45_s19 = int_to_ptr.vmem [resolvable:$true] %s44_s19 }
  0x25   :  { %p698_p3 = scmp.lt.u32.totalorder %s694_s23, %s885_s3 }
  0x27   :  { %p700_p4 = pnand %p698_p3, %p695_p2 }
  0x29   :  { %703 = shalt.err (!%p700_p4)
}
  0x2a   :  { %s704_s28 = scalar_lea.vmem %s45_s19, 1024  ;;  %p709_p6 = scmp.lt.s32.totalorder %s45_s19, %s45_s19 }
  0x2b   :  { %p705_p5 = scmp.ne.s32.totalorder %s45_s19, %s704_s28  ;;  %p710_p7 = scmp.lt.s32.totalorder %s704_s28, %s704_s28 }
  0x2d   :  { %p711_p8 = por %p710_p7, %p709_p6 }
  0x2f   :  { %p712_p9 = pnand %p711_p8, %p705_p5 }
  0x31   :  { %715 = shalt.err (!%p712_p9)
}
  0x32   :  { %50 = dma.hbm_to_vmem [thread:$0]  %s885_s3, 1024, %s45_s19, [#allocation6], %s746_s30, %s746_s30, %s747_s6  }
  0x33   :  { %738 = dma.done.wait [#allocation3], 256  }
  0x34   :  { %739 = vsyncadd [#allocation3], 4294967040 }
  0x35   :  { %740 = dma.done.wait [#allocation6], 1280  }
  0x36   :  { %741 = vsyncadd [#allocation6], 4294966016  ;;  %v622_v0 = vld [vmem:[#allocation7] sm:$0xff]   ;;  %v623_v1 = vld [vmem:[#allocation7 + $0x8] sm:$0xff]   ;;  %v749_v12 = vmov 0.0   ;;  %vm750_vm0 = vmmov 0   ;;  %v338_v44 = vlaneseq }
  0x37   :  { %562 = vmatprep.subr.bf16.mxu0 %v622_v0  ;;  %v624_v2 = vld [vmem:[#allocation7 + $0x10] sm:$0xff]   ;;  %v630_v3 = vld [vmem:[#allocation2] sm:$0xff]   ;;  %v625_v4 = vld [vmem:[#allocation7 + $0x18] sm:$0xff]   ;;  %586 = vmatprep.subr.bf16.mxu1 %v749_v12  ;;  %v751_v42 = vmov 1966171168   ;;  %v752_v52 = vmov 0  }
  0x38   :  { %563 = vmatpush3.bf16.xpose.msra.mxu0 %v622_v0  ;;  %578 = vmatprep.mubr.bf16.mxu0 %v630_v3  ;;  %v626_v5 = vld [vmem:[#allocation7 + $0x20] sm:$0xff]   ;;  %v627_v6 = vld [vmem:[#allocation7 + $0x28] sm:$0xff]   ;;  %v628_v7 = vld [vmem:[#allocation7 + $0x30] sm:$0xff]   ;;  %v336_v43 = vunpack.c.l.s4 %v751_v42  ;;  %v339_v46 = vshrl.u32 %v338_v44, 7  ;;  %vm369_vm4 = vcmask 130048  }
  0x39   :  { %564 = vmatprep.subr.bf16.mxu0 %v623_v1  ;;  %v629_v8 = vld [vmem:[#allocation7 + $0x38] sm:$0xff]   ;;  %v631_v9 = vld [vmem:[#allocation2 + $0x8] sm:$0xff]   ;;  %v632_v10 = vld [vmem:[#allocation5] sm:$0xff]   ;;  %588 = vmatprep.mubr.msk.bf16.mxu1 %vm750_vm0, %v749_v12 }
  0x3a   :  { %v838_v11 = vld [vmem:[#allocation5 + $0x8] sm:$0xff]   ;;  %v530_v13 = vld [vmem:[%s886_s4] ss:$0 sm:$0xff]  ;;  %v337_v45 = vunpack.c.0.s8 %v336_v43  ;;  %v357_v51 = vsub.s32 0, %v339_v46 }
  0x3b   :  { %v539_v48 = vld.sshfl [vmem:[%s884_s2] sm:$0x11 pattern:$0x75316420]  ;;  %s753_s2 = smov [#allocation8]  }
  0x3c   :  { %v340_v47 = vsub.s32 %v337_v45, %v339_v46  ;;  %v334_v50 = vcombine.high %v539_v48, %v539_v48  ;;  %s513_s6 = sshll.u32 %s753_s2, 4  ;;  %s514_s6 = int_to_ptr.vmem [resolvable:$true] %s513_s6 }
  0x3d   :  { %s716_s7 = scalar_lea.vmem %s514_s6, 512  ;;  %p721_p11 = scmp.lt.s32.totalorder %s514_s6, %s514_s6 }
  0x3e   :  { %v341_v49 = vrot.slane %v539_v48, %v340_v47  ;;  %v348_v54 = vrot.slane %v334_v50, %v340_v47  ;;  %p717_p10 = scmp.ne.s32.totalorder %s514_s6, %s716_s7  ;;  %p722_p12 = scmp.lt.s32.totalorder %s716_s7, %s716_s7 }
  0x40   :  { %565 = vmatpush3.bf16.xpose.msra.mxu0 %v623_v1  ;;  %vm351_vm1 = vcmp.gt.f32.partialorder %v341_v49, 0.0  ;;  %vm352_vm2 = vcmp.gt.f32.partialorder %v348_v54, 0.0  ;;  %p723_p13 = por %p722_p12, %p721_p11 }
  0x41   :  { %566 = vmatprep.subr.bf16.mxu0 %v624_v2  ;;  %v353_v53 = vsel %vm351_vm1, 1, %v752_v52  ;;  %v354_v56 = vsel %vm352_vm2, 1, %v752_v52 }
  0x42   :  { %v358_v55 = vrot.slane %v353_v53, %v357_v51  ;;  %v362_v62 = vrot.slane %v354_v56, %v357_v51  ;;  %p724_p0 = pnand %p723_p13, %p717_p10 }
  0x44   :  { %vm363_vm3 = vcmp.eq.s32.totalorder %v358_v55, 1  ;;  %vm364_vm5 = vcmp.eq.s32.totalorder %v362_v62, 1 }
  0x48   :  { %567 = vmatpush3.bf16.xpose.msra.mxu0 %v624_v2 }
  0x49   :  { %568 = vmatprep.subr.bf16.mxu0 %v625_v4 }
  0x50   :  { %569 = vmatpush3.bf16.xpose.msra.mxu0 %v625_v4 }
  0x51   :  { %570 = vmatprep.subr.bf16.mxu0 %v626_v5 }
  0x58   :  { %571 = vmatpush3.bf16.xpose.msra.mxu0 %v626_v5 }
  0x59   :  { %572 = vmatprep.subr.bf16.mxu0 %v627_v6 }
  0x60   :  { %573 = vmatpush3.bf16.xpose.msra.mxu0 %v627_v6 }
  0x61   :  { %574 = vmatprep.subr.bf16.mxu0 %v628_v7 }
  0x68   :  { %575 = vmatpush3.bf16.xpose.msra.mxu0 %v628_v7 }
  0x69   :  { %576 = vmatprep.subr.bf16.mxu0 %v629_v8 }
  0x70   :  { %577 = vmatpush3.bf16.xpose.msra.mxu0 %v629_v8 }
  0x77   :  { %579 = vmatmul.mubr.bf16.vlgmr.msra.gmra.mrb[0].mxu0 %v631_v9 }
  0x78   :  { %582 = vmatprep.mubr.bf16.mxu0 %v632_v10 }
  0x7f   :  { %583 = vmatmul.mubr.bf16.gmra.mrb[4].mxu0 %v838_v11 }
 0x14a   :  { %v580_v14 = vpop.f32.mrb[0].mxu0 }
 0x14b   :  { %v210_v15 = vadd.f32 %v580_v14, %v530_v13  ;;  %v201_v16 = vpop.f32.mrb[1].mxu0 }
 0x14c   :  { %v202_v17 = vadd.f32 %v530_v13, %v201_v16  ;;  %v581_v18 = vpop.f32.mrb[2].mxu0 }
 0x14d   :  { %v213_v19 = vadd.f32 %v581_v18, %v530_v13  ;;  %v204_v20 = vpop.f32.mrb[3].mxu0  ;;  %v234_v22 = vmax.f32 %v210_v15, 0.0 }
 0x14e   :  { %v205_v21 = vadd.f32 %v530_v13, %v204_v20  ;;  %v232_v24 = vmax.f32 %v202_v17, 0.0 }
 0x14f   :  { %v235_v23 = vmax.f32 %v213_v19, 0.0 }
 0x150   :  { %v233_v25 = vmax.f32 %v205_v21, 0.0 }
 0x151   :  { %v241_v26 = vpack.c.bf16 %v235_v23, %v234_v22 }
 0x152   :  { %v240_v27 = vpack.c.bf16 %v233_v25, %v232_v24  ;;  %v584_v28 = vpop.f32.mrb[4].mxu0 }
 0x153   :  { %v226_v29 = vadd.f32 %v584_v28, %v530_v13  ;;  %v217_v30 = vpop.f32.mrb[5].mxu0 }
 0x154   :  { %v218_v31 = vadd.f32 %v530_v13, %v217_v30  ;;  %v585_v32 = vpop.f32.mrb[6].mxu0 }
 0x155   :  { %v229_v33 = vadd.f32 %v585_v32, %v530_v13  ;;  %v220_v34 = vpop.f32.mrb[7].mxu0  ;;  %v238_v36 = vmax.f32 %v226_v29, 0.0 }
 0x156   :  { %v221_v35 = vadd.f32 %v530_v13, %v220_v34  ;;  %v236_v38 = vmax.f32 %v218_v31, 0.0 }
 0x157   :  { %v239_v37 = vmax.f32 %v229_v33, 0.0 }
 0x158   :  { %v237_v39 = vmax.f32 %v221_v35, 0.0 }
 0x159   :  { %v243_v40 = vpack.c.bf16 %v239_v37, %v238_v36 }
 0x15a   :  { %v242_v41 = vpack.c.bf16 %v237_v39, %v236_v38 }
 0x15c   :  { %587 = vmatpush3.bf16.xpose.msra.mxu1 %v242_v41 }
 0x15d   :  { %592 = vmatprep.subr.bf16.mxu1 %v749_v12 }
 0x163   :  { %589 = vmatmul.mubr.bf16.vlgmr.msra.gmra.mrb[0].mxu1 %v240_v27 }
 0x164   :  { %593 = vmatpush3.bf16.xpose.msra.mxu1 %v243_v40  ;;  %594 = vmatprep.mubr.msk.bf16.mxu1 %vm750_vm0, %v749_v12 }
 0x165   :  { %598 = vmatprep.subr.bf16.mxu1 %v749_v12 }
 0x16b   :  { %595 = vmatmul.mubr.bf16.vlgmr.msra.gmra.mrb[4].mxu1 %v241_v26 }
 0x16c   :  { %599 = vmatpush3.bf16.msra.mxu1 %v632_v10  ;;  %600 = vmatprep.mubr.msk.bf16.mxu1 %vm750_vm0, %v749_v12 }
 0x16d   :  { %604 = vmatprep.subr.bf16.mxu1 %v749_v12 }
 0x236   :  { %v278_v57 = vpop.f32.mrb[0].mxu1 }
 0x237   :  { %v365_v58 = vsel %vm363_vm3, -inf, %v278_v57  ;;  %v590_v59 = vpop.f32.mrb[1].mxu1 }
 0x238   :  { %v281_v60 = vpop.f32.mrb[2].mxu1  ;;  %v370_v61 = vsel %vm369_vm4, %v365_v58, -inf }
 0x239   :  { %v366_v63 = vsel %vm363_vm3, -inf, %v281_v60  ;;  %371 = vmax.xlane.f32.xlu0 %v370_v61  ;;  %v591_v0 = vpop.f32.mrb[3].mxu1 }
 0x23a   :  { %v373_v1 = vsel %vm369_vm4, %v366_v63, -inf }
 0x23d   :  { %374 = vmax.xlane.f32.xlu0 %v373_v1 }
 0x23e   :  { %v319_v2 = vpop.f32.mrb[4].mxu1 }
 0x23f   :  { %v367_v3 = vsel %vm364_vm5, -inf, %v319_v2  ;;  %v596_v4 = vpop.f32.mrb[5].mxu1 }
 0x240   :  { %v322_v5 = vpop.f32.mrb[6].mxu1  ;;  %v376_v6 = vsel %vm369_vm4, %v367_v3, -inf }
 0x241   :  { %v368_v7 = vsel %vm364_vm5, -inf, %v322_v5  ;;  %377 = vmax.xlane.f32.xlu1 %v376_v6  ;;  %v597_v8 = vpop.f32.mrb[7].mxu1 }
 0x242   :  { %v379_v9 = vsel %vm369_vm4, %v368_v7, -inf }
 0x245   :  { %380 = vmax.xlane.f32.xlu1 %v379_v9 }
 0x2c6   :  { %v372_v10 = vpop.xlane.xlu0 %371 }
 0x2c7   :  { %v382_v13 = vsub.f32 %v365_v58, %v372_v10 }
 0x2c9   :  { %v386_v14 = vmul.f32 1.442695, %v382_v13 }
 0x2ca   :  { %v375_v15 = vpop.xlane.xlu0 %374 }
 0x2cb   :  { %634 = vpow2.f32 %v386_v14  ;;  %v383_v16 = vsub.f32 %v366_v63, %v375_v15 }
 0x2cd   :  { %v388_v17 = vmul.f32 1.442695, %v383_v16 }
 0x2ce   :  { %v378_v18 = vpop.xlane.xlu1 %377 }
 0x2cf   :  { %636 = vpow2.f32 %v388_v17  ;;  %v384_v19 = vsub.f32 %v367_v3, %v378_v18 }
 0x2d1   :  { %v390_v20 = vmul.f32 1.442695, %v384_v19 }
 0x2d2   :  { %v381_v21 = vpop.xlane.xlu1 %380 }
 0x2d3   :  { %638 = vpow2.f32 %v390_v20  ;;  %v385_v22 = vsub.f32 %v368_v7, %v381_v21 }
 0x2d5   :  { %v635_v23 = vpop.eup %634  ;;  %v392_v24 = vmul.f32 1.442695, %v385_v22 }
 0x2d6   :  { %v394_v25 = vsel %vm369_vm4, %v635_v23, 0.0 }
 0x2d7   :  { %640 = vpow2.f32 %v392_v24  ;;  %395 = vadd.xlane.f32.xlu0 %v394_v25 }
 0x2d9   :  { %v637_v26 = vpop.eup %636 }
 0x2da   :  { %v397_v27 = vsel %vm369_vm4, %v637_v26, 0.0 }
 0x2db   :  { %398 = vadd.xlane.f32.xlu1 %v397_v27 }
 0x2dd   :  { %v639_v28 = vpop.eup %638 }
 0x2de   :  { %v400_v29 = vsel %vm369_vm4, %v639_v28, 0.0 }
 0x2df   :  { %401 = vadd.xlane.f32.xlu0 %v400_v29 }
 0x2e1   :  { %v641_v30 = vpop.eup %640 }
 0x2e2   :  { %v403_v31 = vsel %vm369_vm4, %v641_v30, 0.0 }
 0x2e3   :  { %404 = vadd.xlane.f32.xlu1 %v403_v31 }
 0x364   :  { %v396_v32 = vpop.xlane.xlu0 %395 }
 0x365   :  { %642 = vrcp.f32 %v396_v32 }
 0x368   :  { %v399_v33 = vpop.xlane.xlu1 %398 }
 0x369   :  { %644 = vrcp.f32 %v399_v33 }
 0x36c   :  { %v402_v34 = vpop.xlane.xlu0 %401 }
 0x36d   :  { %646 = vrcp.f32 %v402_v34 }
 0x36f   :  { %v643_v36 = vpop.eup %642 }
 0x370   :  { %v405_v35 = vpop.xlane.xlu1 %404  ;;  %v410_v38 = vmul.f32 %v643_v36, %v635_v23 }
 0x371   :  { %648 = vrcp.f32 %v405_v35 }
 0x373   :  { %v645_v37 = vpop.eup %644 }
 0x374   :  { %v411_v39 = vmul.f32 %v645_v37, %v637_v26 }
 0x376   :  { %v414_v40 = vpack.c.bf16 %v411_v39, %v410_v38 }
 0x377   :  { %v647_v41 = vpop.eup %646 }
 0x378   :  { %601 = vmatmul.mubr.msk.bf16.vlgmr.msra.gmra.mrb[8].mxu1 %vm369_vm4, %v414_v40  ;;  %v412_v43 = vmul.f32 %v647_v41, %v639_v28 }
 0x379   :  { %605 = vmatpush3.bf16.msra.mxu1 %v838_v11  ;;  %606 = vmatprep.mubr.msk.bf16.mxu1 %vm750_vm0, %v749_v12 }
 0x37b   :  { %v649_v42 = vpop.eup %648 }
 0x37c   :  { %v413_v44 = vmul.f32 %v649_v42, %v641_v30 }
 0x37e   :  { %v415_v45 = vpack.c.bf16 %v413_v44, %v412_v43 }
 0x380   :  { %607 = vmatmul.mubr.msk.bf16.vlgmr.msra.gmra.mrb[12].mxu1 %vm369_vm4, %v415_v45 }
 0x44b   :  { %v453_v46 = vpop.f32.mrb[8].mxu1 }
 0x44c   :  { %504 = vst [vmem:[#allocation8] sm:$0xff] %v453_v46  ;;  %v602_v47 = vpop.f32.mrb[9].mxu1 }
 0x44d   :  { %v456_v48 = vpop.f32.mrb[10].mxu1 }
 0x44e   :  { %505 = vst [vmem:[#allocation8 + $0x8] sm:$0xff] %v456_v48  ;;  %v603_v49 = vpop.f32.mrb[11].mxu1 }
 0x453   :  { %v497_v50 = vpop.f32.mrb[12].mxu1 }
 0x454   :  { %506 = vst [vmem:[#allocation8 + $0x10] sm:$0xff] %v497_v50  ;;  %v608_v11 = vpop.f32.mrb[13].mxu1 }
 0x455   :  { %v500_v51 = vpop.f32.mrb[14].mxu1 }
 0x456   :  { %507 = vst [vmem:[#allocation8 + $0x18] sm:$0xff] %v500_v51  ;;  %v609_v12 = vpop.f32.mrb[15].mxu1 }
 0x457   :  { %727 = shalt.err (!%p724_p0)
}
 0x458   :  { %s728_s10 = scalar_lea.hbm %s887_s5, 512 }
 0x459   :  { %p729_p1 = scmp.ne.s32.totalorder %s887_s5, %s728_s10  ;;  %p732_p2 = scmp.lt.u32.totalorder %s728_s10, %s887_s5 }
 0x45b   :  { %p734_p3 = pnand %p732_p2, %p729_p1 }
 0x45d   :  { %737 = shalt.err (!%p734_p3)
}
 0x45e   :  { %s754_s15 = smov 128   ;;  %s755_s16 = smov 8  }
 0x45f   :  { %519 = dma.vmem_to_hbm [thread:$0]  %s514_s6, 512, %s887_s5, [#allocation4], %s754_s15, %s754_s15, %s755_s16  }
 0x460   :  { %742 = dma.done.wait [#allocation4], 512  }
 0x461   :  { %743 = vsyncadd [#allocation4], 4294966784 }
 0x462   :  { %523 = vsyncpa [#allocation3], 1 }
 0x463   :  { %524 = vsyncpa [#allocation6], 1 }
 0x464   :  { %525 = vsyncpa [#allocation4], 1 }

</bundles_post_ra>
